<compile_context>
chip_gen: v6e
topology: v6e:2x2x1
jax: 0.10.0
libtpu: 0.0.40
codegen_flags: <defaults>
</compile_context>

<pallas_src>
import functools

import jax
import jax.numpy as jnp
from jax.experimental import pallas as pl
from jax.experimental.pallas import tpu as pltpu


def _round_up(x: int, m: int) -> int:
    return (x + m - 1) // m * m


def _cdiv(a: int, b: int) -> int:
    return -(-a // b)


def _out_conv_kernel(w_ref, b_ref, x_ref, o_ref):
    """o[co] = sum_ci W[co,ci] * x[ci] + b[co] on (TR, 128) slabs via VPU FMAs.

    w_ref: (Cout, Cin) SMEM    b_ref: (Cout,) SMEM
    x_ref: (Cin, TR, 128) VMEM o_ref: (Cout, TR, 128) VMEM
    """
    cin = x_ref.shape[0]
    cout = o_ref.shape[0]
    # Load + fp32-cast each input-channel slab exactly once (ci outer).
    xs = [x_ref[ci].astype(jnp.float32) for ci in range(cin)]
    for co in range(cout):
        acc = b_ref[co] + w_ref[co, 0] * xs[0]
        for ci in range(1, cin):
            acc = acc + w_ref[co, ci] * xs[ci]
        o_ref[co] = acc.astype(o_ref.dtype)


@functools.partial(jax.jit, static_argnames=("max_tile_m",))
def unet_out_block(x_nchw, weight, bias, *, max_tile_m=65536):
    """Forward pass of UnetOutBlock (1x1 Conv2d, stride 1, bias=True).

    Args:
      x_nchw:  (N, Cin, H, W)
      weight:  (Cout, Cin, 1, 1)   (PyTorch Conv2d weight layout)
      bias:    (Cout,)
    Returns:
      (N, Cout, H, W), same dtype as x.
    """
    N, Cin, H, W = x_nchw.shape
    Cout = weight.shape[0]
    HW = H * W
    itemsize = jnp.dtype(x_nchw.dtype).itemsize
    sub = max(8, 32 // itemsize)  # sublane multiple for this dtype (8 f32, 16 bf16)

    # Pad flattened spatial axis to a multiple of 128 lanes (<= 127 elements,
    # usually a no-op), then repack spatial onto (rows, 128) -> full vregs.
    HW_pad = _round_up(HW, 128)
    R = HW_pad // 128

    x3 = x_nchw.reshape(N, Cin, HW)
    if HW_pad != HW:
        x3 = jnp.pad(x3, ((0, 0), (0, 0), (0, HW_pad - HW)))
    x4 = x3.reshape(N, Cin, R, 128)

    # Rows of 128 lanes per grid step: as large as possible (few grid steps),
    # capped so double-buffered in/out blocks + fp32 intermediates stay well
    # under the scoped VMEM defaults and v7x's 64 MiB physical VMEM.
    bytes_per_row = 128 * (2 * (Cin + Cout) * itemsize + (Cin + 1) * 4)
    vmem_cap_rows = max(sub, (8 * 1024 * 1024) // bytes_per_row // sub * sub)
    target_tr = max(sub, (max_tile_m // 128) // sub * sub)
    target_tr = min(target_tr, vmem_cap_rows)

    tr = R if R <= target_tr else target_tr
    # v7x megacore: keep >= 2 steps along a parallel axis when batch == 1.
    if N == 1 and _cdiv(R, tr) == 1 and R > sub:
        tr = _round_up(_cdiv(R, 2), sub)

    n_spatial = _cdiv(R, tr)
    grid = (N, n_spatial)

    w_mat = weight.reshape(Cout, Cin).astype(jnp.float32)  # SMEM scalars
    b_vec = bias.reshape(Cout).astype(jnp.float32)         # SMEM scalars

    cost = pl.CostEstimate(
        flops=2 * N * HW_pad * Cin * Cout,
        transcendentals=0,
        bytes_accessed=N * HW_pad * (Cin + Cout) * itemsize
                       + (Cin * Cout + Cout) * 4,
    )

    out4 = pl.pallas_call(
        _out_conv_kernel,
        out_shape=jax.ShapeDtypeStruct((N, Cout, R, 128), x_nchw.dtype),
        grid_spec=pltpu.PrefetchScalarGridSpec(
            num_scalar_prefetch=0,
            grid=grid,
            in_specs=[
                pl.BlockSpec(memory_space=pltpu.MemorySpace.SMEM),      # W
                pl.BlockSpec(memory_space=pltpu.MemorySpace.SMEM),      # b
                pl.BlockSpec((None, Cin, tr, 128), lambda n, i: (n, 0, i, 0)),
            ],
            out_specs=pl.BlockSpec((None, Cout, tr, 128),
                                   lambda n, i: (n, 0, i, 0)),
        ),
        compiler_params=pltpu.CompilerParams(
            dimension_semantics=("parallel", "parallel")),
        cost_estimate=cost,
    )(w_mat, b_vec, x4)

    out3 = out4.reshape(N, Cout, HW_pad)
    if HW_pad != HW:
        out3 = out3[:, :, :HW]
    return out3.reshape(N, Cout, H, W)


if __name__ == "__main__":
    # Module config: spatial_dims=2, in_channels=4, out_channels=3
    N, Cin, H, W = 2, 4, 16, 16
    Cout = 3

    key = jax.random.PRNGKey(0)
    kx, kw, kb = jax.random.split(key, 3)

    x = jax.random.normal(kx, (N, Cin, H, W), dtype=jnp.float32)
    weight = jax.random.normal(kw, (Cout, Cin, 1, 1), dtype=jnp.float32) * 0.1
    bias = jax.random.normal(kb, (Cout,), dtype=jnp.float32) * 0.1

    out = jax.block_until_ready(unet_out_block(x, weight, bias))

    # Reference: 1x1 conv == per-pixel channel matmul + bias.
    ref = (jnp.einsum("nchw,oc->nohw", x, weight.reshape(Cout, Cin))
           + bias[None, :, None, None])
    assert out.shape == (N, Cout, H, W)
    assert jnp.allclose(out, ref, atol=1e-5, rtol=1e-5)

    print("KERNEL_OK")
</pallas_src>

<mosaic_0001>
module attributes {stable_mosaic.version = 11 : i64} {
  func.func @_out_conv_kernel(%arg0: i32, %arg1: i32, %arg2: memref<3x4xf32, #tpu.memory_space<smem>>, %arg3: memref<3xf32, #tpu.memory_space<smem>>, %arg4: memref<1x4x2x128xf32, #tpu.memory_space<vmem>>, %arg5: memref<1x3x2x128xf32, #tpu.memory_space<vmem>>) attributes {dimension_semantics = [#tpu.dimension_semantics<parallel>, #tpu.dimension_semantics<parallel>], iteration_bounds = array<i64: 2, 1>, scalar_prefetch = 0 : i64, scratch_operands = 0 : i64, tpu.core_type = #tpu.core_type<tc>, window_params = [{transform_indices = @transform_0, window_bounds = array<i64: 3, 4>}, {transform_indices = @transform_1, window_bounds = array<i64: 3>}, {transform_indices = @transform_2, window_bounds = array<i64: 1, 4, 2, 128>}, {transform_indices = @transform_3, window_bounds = array<i64: 1, 3, 2, 128>}]} {
    %c0 = arith.constant 0 : index
    %c0_0 = arith.constant 0 : index
    %c0_1 = arith.constant 0 : index
    %c0_2 = arith.constant 0 : index
    %0 = vector.load %arg4[%c0, %c0_0, %c0_1, %c0_2] : memref<1x4x2x128xf32, #tpu.memory_space<vmem>>, vector<1x1x2x128xf32>
    %1 = vector.shape_cast %0 : vector<1x1x2x128xf32> to vector<2x128xf32>
    %c0_3 = arith.constant 0 : index
    %c1 = arith.constant 1 : index
    %c0_4 = arith.constant 0 : index
    %c0_5 = arith.constant 0 : index
    %2 = vector.load %arg4[%c0_3, %c1, %c0_4, %c0_5] : memref<1x4x2x128xf32, #tpu.memory_space<vmem>>, vector<1x1x2x128xf32>
    %3 = vector.shape_cast %2 : vector<1x1x2x128xf32> to vector<2x128xf32>
    %c0_6 = arith.constant 0 : index
    %c2 = arith.constant 2 : index
    %c0_7 = arith.constant 0 : index
    %c0_8 = arith.constant 0 : index
    %4 = vector.load %arg4[%c0_6, %c2, %c0_7, %c0_8] : memref<1x4x2x128xf32, #tpu.memory_space<vmem>>, vector<1x1x2x128xf32>
    %5 = vector.shape_cast %4 : vector<1x1x2x128xf32> to vector<2x128xf32>
    %c0_9 = arith.constant 0 : index
    %c3 = arith.constant 3 : index
    %c0_10 = arith.constant 0 : index
    %c0_11 = arith.constant 0 : index
    %6 = vector.load %arg4[%c0_9, %c3, %c0_10, %c0_11] : memref<1x4x2x128xf32, #tpu.memory_space<vmem>>, vector<1x1x2x128xf32>
    %7 = vector.shape_cast %6 : vector<1x1x2x128xf32> to vector<2x128xf32>
    %c0_12 = arith.constant 0 : index
    %8 = memref.load %arg3[%c0_12] : memref<3xf32, #tpu.memory_space<smem>>
    %c0_13 = arith.constant 0 : index
    %c0_14 = arith.constant 0 : index
    %9 = memref.load %arg2[%c0_13, %c0_14] : memref<3x4xf32, #tpu.memory_space<smem>>
    %10 = vector.broadcast %9 : f32 to vector<2x128xf32>
    %11 = arith.mulf %10, %1 : vector<2x128xf32>
    %12 = vector.broadcast %8 : f32 to vector<2x128xf32>
    %13 = arith.addf %12, %11 : vector<2x128xf32>
    %c0_15 = arith.constant 0 : index
    %c1_16 = arith.constant 1 : index
    %14 = memref.load %arg2[%c0_15, %c1_16] : memref<3x4xf32, #tpu.memory_space<smem>>
    %15 = vector.broadcast %14 : f32 to vector<2x128xf32>
    %16 = arith.mulf %15, %3 : vector<2x128xf32>
    %17 = arith.addf %13, %16 : vector<2x128xf32>
    %c0_17 = arith.constant 0 : index
    %c2_18 = arith.constant 2 : index
    %18 = memref.load %arg2[%c0_17, %c2_18] : memref<3x4xf32, #tpu.memory_space<smem>>
    %19 = vector.broadcast %18 : f32 to vector<2x128xf32>
    %20 = arith.mulf %19, %5 : vector<2x128xf32>
    %21 = arith.addf %17, %20 : vector<2x128xf32>
    %c0_19 = arith.constant 0 : index
    %c3_20 = arith.constant 3 : index
    %22 = memref.load %arg2[%c0_19, %c3_20] : memref<3x4xf32, #tpu.memory_space<smem>>
    %23 = vector.broadcast %22 : f32 to vector<2x128xf32>
    %24 = arith.mulf %23, %7 : vector<2x128xf32>
    %25 = arith.addf %21, %24 : vector<2x128xf32>
    %c0_21 = arith.constant 0 : index
    %c0_22 = arith.constant 0 : index
    %c0_23 = arith.constant 0 : index
    %c0_24 = arith.constant 0 : index
    %26 = vector.load %arg5[%c0_21, %c0_22, %c0_23, %c0_24] : memref<1x3x2x128xf32, #tpu.memory_space<vmem>>, vector<1x1x2x128xf32>
    %27 = vector.shape_cast %26 : vector<1x1x2x128xf32> to vector<2x128xf32>
    %28 = vector.shape_cast %25 : vector<2x128xf32> to vector<1x1x2x128xf32>
    tpu.vector_store %arg5[%c0_21, %c0_22, %c0_23, %c0_24], %28 {strides = array<i32>} : memref<1x3x2x128xf32, #tpu.memory_space<vmem>>, vector<1x1x2x128xf32>,
    %c1_25 = arith.constant 1 : index
    %29 = memref.load %arg3[%c1_25] : memref<3xf32, #tpu.memory_space<smem>>
    %c1_26 = arith.constant 1 : index
    %c0_27 = arith.constant 0 : index
    %30 = memref.load %arg2[%c1_26, %c0_27] : memref<3x4xf32, #tpu.memory_space<smem>>
    %31 = vector.broadcast %30 : f32 to vector<2x128xf32>
    %32 = arith.mulf %31, %1 : vector<2x128xf32>
    %33 = vector.broadcast %29 : f32 to vector<2x128xf32>
    %34 = arith.addf %33, %32 : vector<2x128xf32>
    %c1_28 = arith.constant 1 : index
    %c1_29 = arith.constant 1 : index
    %35 = memref.load %arg2[%c1_28, %c1_29] : memref<3x4xf32, #tpu.memory_space<smem>>
    %36 = vector.broadcast %35 : f32 to vector<2x128xf32>
    %37 = arith.mulf %36, %3 : vector<2x128xf32>
    %38 = arith.addf %34, %37 : vector<2x128xf32>
    %c1_30 = arith.constant 1 : index
    %c2_31 = arith.constant 2 : index
    %39 = memref.load %arg2[%c1_30, %c2_31] : memref<3x4xf32, #tpu.memory_space<smem>>
    %40 = vector.broadcast %39 : f32 to vector<2x128xf32>
    %41 = arith.mulf %40, %5 : vector<2x128xf32>
    %42 = arith.addf %38, %41 : vector<2x128xf32>
    %c1_32 = arith.constant 1 : index
    %c3_33 = arith.constant 3 : index
    %43 = memref.load %arg2[%c1_32, %c3_33] : memref<3x4xf32, #tpu.memory_space<smem>>
    %44 = vector.broadcast %43 : f32 to vector<2x128xf32>
    %45 = arith.mulf %44, %7 : vector<2x128xf32>
    %46 = arith.addf %42, %45 : vector<2x128xf32>
    %c0_34 = arith.constant 0 : index
    %c1_35 = arith.constant 1 : index
    %c0_36 = arith.constant 0 : index
    %c0_37 = arith.constant 0 : index
    %47 = vector.load %arg5[%c0_34, %c1_35, %c0_36, %c0_37] : memref<1x3x2x128xf32, #tpu.memory_space<vmem>>, vector<1x1x2x128xf32>
    %48 = vector.shape_cast %47 : vector<1x1x2x128xf32> to vector<2x128xf32>
    %49 = vector.shape_cast %46 : vector<2x128xf32> to vector<1x1x2x128xf32>
    tpu.vector_store %arg5[%c0_34, %c1_35, %c0_36, %c0_37], %49 {strides = array<i32>} : memref<1x3x2x128xf32, #tpu.memory_space<vmem>>, vector<1x1x2x128xf32>,
    %c2_38 = arith.constant 2 : index
    %50 = memref.load %arg3[%c2_38] : memref<3xf32, #tpu.memory_space<smem>>
    %c2_39 = arith.constant 2 : index
    %c0_40 = arith.constant 0 : index
    %51 = memref.load %arg2[%c2_39, %c0_40] : memref<3x4xf32, #tpu.memory_space<smem>>
    %52 = vector.broadcast %51 : f32 to vector<2x128xf32>
    %53 = arith.mulf %52, %1 : vector<2x128xf32>
    %54 = vector.broadcast %50 : f32 to vector<2x128xf32>
    %55 = arith.addf %54, %53 : vector<2x128xf32>
    %c2_41 = arith.constant 2 : index
    %c1_42 = arith.constant 1 : index
    %56 = memref.load %arg2[%c2_41, %c1_42] : memref<3x4xf32, #tpu.memory_space<smem>>
    %57 = vector.broadcast %56 : f32 to vector<2x128xf32>
    %58 = arith.mulf %57, %3 : vector<2x128xf32>
    %59 = arith.addf %55, %58 : vector<2x128xf32>
    %c2_43 = arith.constant 2 : index
    %c2_44 = arith.constant 2 : index
    %60 = memref.load %arg2[%c2_43, %c2_44] : memref<3x4xf32, #tpu.memory_space<smem>>
    %61 = vector.broadcast %60 : f32 to vector<2x128xf32>
    %62 = arith.mulf %61, %5 : vector<2x128xf32>
    %63 = arith.addf %59, %62 : vector<2x128xf32>
    %c2_45 = arith.constant 2 : index
    %c3_46 = arith.constant 3 : index
    %64 = memref.load %arg2[%c2_45, %c3_46] : memref<3x4xf32, #tpu.memory_space<smem>>
    %65 = vector.broadcast %64 : f32 to vector<2x128xf32>
    %66 = arith.mulf %65, %7 : vector<2x128xf32>
    %67 = arith.addf %63, %66 : vector<2x128xf32>
    %c0_47 = arith.constant 0 : index
    %c2_48 = arith.constant 2 : index
    %c0_49 = arith.constant 0 : index
    %c0_50 = arith.constant 0 : index
    %68 = vector.load %arg5[%c0_47, %c2_48, %c0_49, %c0_50] : memref<1x3x2x128xf32, #tpu.memory_space<vmem>>, vector<1x1x2x128xf32>
    %69 = vector.shape_cast %68 : vector<1x1x2x128xf32> to vector<2x128xf32>
    %70 = vector.shape_cast %67 : vector<2x128xf32> to vector<1x1x2x128xf32>
    tpu.vector_store %arg5[%c0_47, %c2_48, %c0_49, %c0_50], %70 {strides = array<i32>} : memref<1x3x2x128xf32, #tpu.memory_space<vmem>>, vector<1x1x2x128xf32>,
    return
  }
  func.func @transform_0(%arg0: i32, %arg1: i32) -> (i32, i32) {
    %c0_i32 = arith.constant 0 : i32
    %c0_i32_0 = arith.constant 0 : i32
    %c0_i32_1 = arith.constant 0 : i32
    return %c0_i32, %c0_i32_0 : i32, i32
  }
  func.func @transform_1(%arg0: i32, %arg1: i32) -> i32 {
    %c0_i32 = arith.constant 0 : i32
    %c0_i32_0 = arith.constant 0 : i32
    return %c0_i32 : i32
  }
  func.func @transform_2(%arg0: i32, %arg1: i32) -> (i32, i32, i32, i32) {
    %c0_i32 = arith.constant 0 : i32
    %c0_i32_0 = arith.constant 0 : i32
    %c0_i32_1 = arith.constant 0 : i32
    return %arg0, %c0_i32, %arg1, %c0_i32_0 : i32, i32, i32, i32
  }
  func.func @transform_3(%arg0: i32, %arg1: i32) -> (i32, i32, i32, i32) {
    %c0_i32 = arith.constant 0 : i32
    %c0_i32_0 = arith.constant 0 : i32
    %c0_i32_1 = arith.constant 0 : i32
    return %arg0, %c0_i32, %arg1, %c0_i32_0 : i32, i32, i32, i32
  }
}

</mosaic_0001>

<bundles_post_ra>
// kernel: unet_out_block.1
= control target key start
LH: loop header
LB: loop body
LE: loop exit
PB: predicated region body
PF: predicated region fallthrough
CT: control target
= control target key end

     0   :  { %8 = vsyncpa [#allocation3], 0  ;;  %s652_s0 = inlined_call_operand.vmem [shape: f32[3,4], index: 0, kind: input, shape index: {}]   ;;  %s653_s1 = inlined_call_operand.vmem [shape: f32[3], index: 1, kind: input, shape index: {}]   ;;  %s654_s2 = inlined_call_operand.vmem [shape: f32[2,4,2,128], index: 2, kind: input, shape index: {}]   ;;  %s655_s3 = inlined_call_operand.vmem [shape: f32[2,3,2,128], index: 3, kind: output, shape index: {}]  }
   0x1   :  { %9 = vsyncpa [#allocation5], 0  ;;  %s564_s12 = smov 0   ;;  %s566_s13 = smov 0  }
   0x2   :  { %s568_s14 = smov 0  }
   0x3 LB: > { %s401_s15 = sadd.s32 4294967295, %s540_s14   ;;  %s27_s16 = sadd.s32 1, %s536_s13  ;;  %s540_s14 = sphi %s568_s14, %s15_s14   ;;  %s536_s13 = sphi %s566_s13, %s665_s13   ;;  %s532_s12 = sphi %s564_s12, %s664_s12  }
   0x4   : > { %p29_p0 = scmp.ge.s32.totalorder %s27_s16, 2  ;;  %p403_p1 = scmp.ge.s32.totalorder %s540_s14, 1 }
   0x5   : > { %p130_p2 = scmp.lt.s32.totalorder %s540_s14, 3  ;;  %p589_p4 = scmp.eq.s32.totalorder %s401_s15, 0 }
   0x6   : > { %s667_s16 = smov (%p29_p0, %s27_s16), 0  ;;  %s143_s21 = sshll.u32 %s652_s0, 4  ;;  %s144_s21 = int_to_ptr.vmem [resolvable:$true] %s143_s21 }
   0x7   : > { %p585_p3 = pnand %p403_p1, %p130_p2  ;;  %s154_s24 = sshll.u32 %s653_s1, 4  ;;  %s155_s24 = int_to_ptr.vmem [resolvable:$true] %s154_s24 }
   0x8   : > { %s660_s18 = scalar_select %p589_p4, 1, 0 }
   0x9   : > { %s659_s17 = scalar_select %p585_p3, 1, 0 }
   0xa   : > { %p443_p5 = pneg %p585_p3  ;;  %s480_s26 = scalar_lea.vmem %s144_s21, 64 }
   0xb   : > { %p481_p7 = scmp.ne.s32.totalorder %s144_s21, %s480_s26  ;;  %p488_p11 = scmp.lt.s32.totalorder %s144_s21, %s144_s21 }
   0xc   : > { %p603_p6 = pnand %p589_p4, %p443_p5  ;;  %p489_p12 = scmp.lt.s32.totalorder %s480_s26, %s480_s26 }
   0xe   : > { %p482_p8 = pneg %p603_p6  ;;  %p490_p13 = por %p489_p12, %p488_p11 }
  0x10   : > { %p483_p9 = pnand %p482_p8, %p481_p7 }
  0x12   : > { %p484_p10 = pneg %p483_p9 }
  0x14   : > { %p491_p0 = pnand %p490_p13, %p484_p10 }
  0x16   : > { %494 = shalt.err (!%p491_p0)
}
  0x17   : > { %s542_s27 = smov [#allocation2]   ;;  %s495_s28 = scalar_lea.vmem %s155_s24, 16 }
  0x18   : > { %446 = dma.vmem_to_smem (!%p603_p6), %s144_s21, 64, %s542_s27, [#allocation3]  }
  0x19   : > { %p496_p1 = scmp.ne.s32.totalorder %s155_s24, %s495_s28  ;;  %p503_p4 = scmp.lt.s32.totalorder %s155_s24, %s155_s24 }
  0x1a   : > { %p504_p3 = scmp.lt.s32.totalorder %s495_s28, %s495_s28 }
  0x1b   : > { %p498_p2 = pnand %p496_p1, %p482_p8 }
  0x1c   : > { %p505_p7 = por %p504_p3, %p503_p4 }
  0x1d   : > { %p499_p5 = pneg %p498_p2 }
  0x1f   : > { %p506_p9 = pnand %p505_p7, %p499_p5 }
  0x21   : > { %509 = shalt.err (!%p506_p9)
}
  0x22   : > { %s543_s29 = smov [#allocation4]   ;;  %p662_p10 = scmp.ne.s32.totalorder %s659_s17, 0 }
  0x23   : > { %449 = dma.vmem_to_smem (!%p603_p6), %s155_s24, 16, %s543_s29, [#allocation5]  }
  0x24   : > { %178 = sbr.rel (%p662_p10) target bundleno = 75 (0x4b), region = 32  ;;  %p663_p11 = scmp.ne.s32.totalorder (!%p662_p10), %s660_s18, 0 }
  0x29   : > { %523 = dma.done.wait (%p663_p11), [#allocation3], 64  }
  0x2a   : > { %525 = vsyncadd (%p663_p11), [#allocation3], 4294967232 }
  0x2b   : > { %527 = dma.done.wait (%p663_p11), [#allocation5], 16  }
  0x2c   : > { %529 = vsyncadd (%p663_p11), [#allocation5], 4294967280 }
  0x2d   : > { %188 = sfence }
  0x2e   : > { %p213_p3 = scmp.lt.s32.totalorder %s532_s12, 1  ;;  %s236_s30 = sld [smem:[#allocation4]] }
  0x2f   : > { %s237_s4 = sld [smem:[#allocation2]] }
  0x30   : > { %s669_s12 = smov (!%p213_p3, %s532_s12), 1  ;;  %s416_s5 = sld [smem:[#allocation2 + $0x1]] }
  0x31   : > { %s433_s6 = sshll.u32 %s669_s12, 3  ;;  %s417_s10 = sld [smem:[#allocation2 + $0x2]] }
  0x32   : > { %s220_s9 = scalar_lea.vmem %s654_s2, %s433_s6  ;;  %s418_s11 = sld [smem:[#allocation2 + $0x3]] }
  0x33   : > { %v229_v0 = vld [vmem:[%s220_s9] sm:$0x3]  ;;  %v413_v1 = vld [vmem:[%s220_s9 + $0x2] sm:$0x3]  ;;  %s631_s15 = sld [smem:[#allocation4 + $0x1]]  ;;  %s434_s19 = smul.u32 6, %s669_s12 }
  0x34   : > { %v240_v3 = vstv %s236_s30  ;;  %v414_v5 = vld [vmem:[%s220_s9 + $0x4] sm:$0x3]  ;;  %s420_s17 = sld [smem:[#allocation2 + $0x80]]  ;;  %v415_v9 = vld [vmem:[%s220_s9 + $0x6] sm:$0x3] }
  0x35   : > { %v238_v2 = vstv %s237_s4  ;;  %s421_s18 = sld [smem:[#allocation2 + $0x81]]  ;;  %s637_s26 = scalar_lea.vmem %s655_s3, %s434_s19 }
  0x36   : > { %v239_v4 = vmul.f32 %v238_v2, %v229_v0  ;;  %v243_v6 = vstv %s416_s5  ;;  %s422_s20 = sld [smem:[#allocation2 + $0x82]] }
  0x37   : > { %v244_v8 = vmul.f32 %v413_v1, %v243_v6  ;;  %v247_v10 = vstv %s417_s10  ;;  %s423_s21 = sld [smem:[#allocation2 + $0x83]] }
  0x38   : > { %v241_v7 = vadd.f32 %v240_v3, %v239_v4  ;;  %v248_v12 = vmul.f32 %v414_v5, %v247_v10  ;;  %v251_v13 = vstv %s418_s11  ;;  %s425_s22 = sld [smem:[#allocation4 + $0x2]] }
  0x39   : > { %v252_v15 = vmul.f32 %v415_v9, %v251_v13  ;;  %s426_s23 = sld [smem:[#allocation2 + $0x100]]  ;;  %v259_v17 = vstv %s631_s15 }
  0x3a   : > { %v245_v11 = vadd.f32 %v244_v8, %v241_v7  ;;  %v257_v16 = vstv %s420_s17  ;;  %s427_s12 = sld [smem:[#allocation2 + $0x101]] }
  0x3b   : > { %v258_v19 = vmul.f32 %v257_v16, %v229_v0  ;;  %v262_v20 = vstv %s421_s18  ;;  %s428_s27 = sld [smem:[#allocation2 + $0x102]] }
  0x3c   : > { %v249_v14 = vadd.f32 %v248_v12, %v245_v11  ;;  %v263_v21 = vmul.f32 %v413_v1, %v262_v20  ;;  %v266_v22 = vstv %s422_s20  ;;  %s429_s28 = sld [smem:[#allocation2 + $0x103]] }
  0x3d   : > { %v260_v23 = vadd.f32 %v259_v17, %v258_v19  ;;  %v267_v24 = vmul.f32 %v414_v5, %v266_v22  ;;  %v270_v25 = vstv %s423_s21 }
  0x3e   : > { %v253_v18 = vadd.f32 %v252_v15, %v249_v14  ;;  %v271_v27 = vmul.f32 %v415_v9, %v270_v25  ;;  %v279_v29 = vstv %s425_s22 }
  0x3f   : > { %v264_v26 = vadd.f32 %v263_v21, %v260_v23  ;;  %v277_v28 = vstv %s426_s23 }
  0x40   : > { %254 = vst [vmem:[%s637_s26] sm:$0x3] %v253_v18  ;;  %v278_v30 = vmul.f32 %v277_v28, %v229_v0  ;;  %v282_v31 = vstv %s427_s12 }
  0x41   : > { %v268_v32 = vadd.f32 %v267_v24, %v264_v26  ;;  %v283_v33 = vmul.f32 %v413_v1, %v282_v31  ;;  %v286_v34 = vstv %s428_s27 }
  0x42   : > { %v280_v35 = vadd.f32 %v279_v29, %v278_v30  ;;  %v287_v36 = vmul.f32 %v414_v5, %v286_v34  ;;  %v290_v37 = vstv %s429_s28 }
  0x43   : > { %v272_v38 = vadd.f32 %v271_v27, %v268_v32  ;;  %v291_v40 = vmul.f32 %v415_v9, %v290_v37 }
  0x44   : > { %v284_v39 = vadd.f32 %v283_v33, %v280_v35 }
  0x45   : > { %424 = vst [vmem:[%s637_s26 + $0x2] sm:$0x3] %v272_v38 }
  0x46   : > { %v288_v41 = vadd.f32 %v287_v36, %v284_v39 }
  0x48   : > { %v292_v42 = vadd.f32 %v291_v40, %v288_v41 }
  0x4a   : > { %430 = vst [vmem:[%s637_s26 + $0x4] sm:$0x3] %v292_v42 }
  0x4b PF: > { %s15_s14 = sadd.s32 1, %s540_s14   ;;  %s664_s12 = smov %s536_s13 }
  0x4c   : > { %p12_p4 = scmp.ge.s32.totalorder %s15_s14, 4   ;;  %s665_s13 = smov %s667_s16 }
  0x4e   :  { %14 = sbr.rel (!%p12_p4) target bundleno = 3 (0x3), region = 76 }
  0x53   :  { %322 = vsyncpa [#allocation3], 1 }
  0x54   :  { %324 = vsyncpa [#allocation3 + $0x1], 1 }
  0x55   :  { %325 = vsyncpa [#allocation5], 1 }

</bundles_post_ra>
